<compile_context>
chip_gen: v7x
topology: tpu7x:2x2x1
jax: 0.10.0
libtpu: 0.0.40
codegen_flags: <defaults>
</compile_context>

<pallas_src>
import functools

import jax
import jax.numpy as jnp
from jax import lax
from jax.experimental import pallas as pl
from jax.experimental.pallas import tpu as pltpu


def _attn_dropout_kernel(q_ref, k_ref, v_ref, bits_ref, bias_ref, o_ref, *,
                         scale, threshold, keep_prob):
    # q_ref:    (TB*Lq, D)      f32  (TB batches collapsed onto sublanes)
    # k_ref:    (TB*Lk, D)      f32
    # v_ref:    (TB*Lk, Dv)     f32
    # bits_ref: (TB*Lq, TB*Lk)  uint32 dropout randomness (diag blocks used)
    # bias_ref: (TB*Lq, TB*Lk)  f32 block-diagonal mask (0 on-diag / -1e30 off)
    # o_ref:    (TB*Lq, Dv)     f32
    q = q_ref[...].astype(jnp.bfloat16)
    k = k_ref[...].astype(jnp.bfloat16)

    # Matmul 1 (MXU, bf16 in / f32 acc): scores for all TB batches at once,
    # contracting over D on both operands (no explicit k transpose).
    s = lax.dot_general(q, k,
                        dimension_numbers=(((1,), (1,)), ((), ())),
                        preferred_element_type=jnp.float32)
    # Scale, then mask off cross-batch blocks so they contribute nothing to
    # the softmax denominator.
    s = s * jnp.float32(scale) + bias_ref[...]

    # Softmax over keys.  The dropout 1/(1-p) rescale is folded into the
    # normalization; the divide runs on the EUP via approx reciprocal.
    m = jnp.max(s, axis=-1, keepdims=True)
    e = jnp.exp(s - m)
    denom = jnp.sum(e, axis=-1, keepdims=True)
    inv = pl.reciprocal(denom * jnp.float32(keep_prob), approx=True)

    # Dropout: keep element iff bits >= uint32(round(p * 2**32)).
    keep = bits_ref[...] >= jnp.uint32(threshold)
    probs = jnp.where(keep, e * inv, jnp.float32(0.0))

    # Matmul 2 (MXU): off-diagonal probs are exactly zero, so this dense
    # matmul equals the batched `probs @ value`.
    out = lax.dot_general(probs.astype(jnp.bfloat16),
                          v_ref[...].astype(jnp.bfloat16),
                          dimension_numbers=(((1,), (0,)), ((), ())),
                          preferred_element_type=jnp.float32)
    o_ref[...] = out.astype(o_ref.dtype)


def _pick_tile_b(B, Lq, Lk, max_tile=32):
    """Largest divisor of B such that (a) the grid has >=2 steps when B >= 2
    (so the "parallel" axis shards across v7x's two TensorCores) and (b) the
    collapsed sublane dims tb*Lq / tb*Lk are multiples of 8 (legal BlockSpec).
    Falls back to tb=B (full-array blocks, always legal) if nothing fits."""
    cap = min(B, max_tile)
    if B >= 2:
        cap = min(cap, B // 2)
    cap = max(cap, 1)
    divs = [t for t in range(1, cap + 1) if B % t == 0]
    aligned = [t for t in divs if (t * Lq) % 8 == 0 and (t * Lk) % 8 == 0]
    if aligned:
        return max(aligned)
    return B


def attention_dropout(query, key, value, dropout_p, rng_key, max_tile=32):
    """query: (B, Lq, D), key: (B, Lk, D), value: (B, Lk, Dv) -> (B, Lq, Dv)."""
    B, Lq, D = query.shape
    _, Lk, _ = key.shape
    Dv = value.shape[-1]

    p = float(dropout_p)
    if p >= 1.0:
        # torch.nn.functional.dropout(p=1.0) returns exact zeros.
        return jnp.zeros((B, Lq, Dv), dtype=jnp.float32)
    keep_prob = 1.0 - p
    threshold = min(int(round(p * 4294967296.0)), 4294967295)

    tb = _pick_tile_b(B, Lq, Lk, max_tile=max_tile)
    grid = (B // tb,)

    # Collapse the batch onto the sublane dim in the wrapper (free reshapes):
    # every kernel operand becomes a dense, lane-major 2-D tile.
    q2 = query.reshape(B * Lq, D).astype(jnp.float32)
    k2 = key.reshape(B * Lk, D).astype(jnp.float32)
    v2 = value.reshape(B * Lk, Dv).astype(jnp.float32)

    # Dropout randomness (uint32) from the JAX RNG; only the diagonal
    # (in-batch) blocks of each (tb*Lq, tb*Lk) tile are consumed in-kernel.
    bits = jax.random.bits(rng_key, (B * Lq, tb * Lk), dtype=jnp.uint32)

    # Block-diagonal additive mask: 0 where row-batch == col-batch, -1e30
    # elsewhere.  Same block every grid step (constant index_map).
    row_b = jnp.arange(tb * Lq, dtype=jnp.int32)[:, None] // Lq
    col_b = jnp.arange(tb * Lk, dtype=jnp.int32)[None, :] // Lk
    bias = jnp.where(row_b == col_b, 0.0, -1e30).astype(jnp.float32)

    kernel = functools.partial(_attn_dropout_kernel, scale=0.5,
                               threshold=threshold, keep_prob=keep_prob)

    out2 = pl.pallas_call(
        kernel,
        out_shape=jax.ShapeDtypeStruct((B * Lq, Dv), jnp.float32),
        grid=grid,
        in_specs=[
            pl.BlockSpec((tb * Lq, D), lambda b: (b, 0)),         # query
            pl.BlockSpec((tb * Lk, D), lambda b: (b, 0)),         # key
            pl.BlockSpec((tb * Lk, Dv), lambda b: (b, 0)),        # value
            pl.BlockSpec((tb * Lq, tb * Lk), lambda b: (b, 0)),   # dropout bits
            pl.BlockSpec((tb * Lq, tb * Lk), lambda b: (0, 0)),   # block-diag bias
        ],
        out_specs=pl.BlockSpec((tb * Lq, Dv), lambda b: (b, 0)),
        compiler_params=pltpu.CompilerParams(
            # Pure data parallelism over batch blocks (no cross-step state).
            dimension_semantics=("parallel",)),
    )(q2, k2, v2, bits, bias)

    return out2.reshape(B, Lq, Dv)


if __name__ == "__main__":
    # Small shapes consistent with the module (Lq=10, Lk=12, D=256, Dv=1024),
    # with a reduced batch so the script stays tiny.  tb=4 -> grid (2,), so
    # both TensorCores get work on v7x.
    B, Lq, Lk, D, Dv = 8, 10, 12, 256, 1024

    root = jax.random.PRNGKey(0)
    kq, kk, kv, kp, kd = jax.random.split(root, 5)
    query = jax.random.normal(kq, (B, Lq, D), dtype=jnp.float32)
    key = jax.random.normal(kk, (B, Lk, D), dtype=jnp.float32)
    value = jax.random.normal(kv, (B, Lk, Dv), dtype=jnp.float32)

    # Mirrors `self.dropout_p = torch.rand(1)` -- deterministic in-script init.
    dropout_p = float(jax.random.uniform(kp, ()))

    out = attention_dropout(query, key, value, dropout_p, kd)
    out = jax.block_until_ready(out)

    assert out.shape == (B, Lq, Dv)
    assert bool(jnp.all(jnp.isfinite(out)))
    print("KERNEL_OK")
</pallas_src>

<mosaic_0001>
module attributes {stable_mosaic.version = 11 : i64} {
  func.func @_attn_dropout_kernel(%arg0: i32, %arg1: memref<40x256xf32, #tpu.memory_space<vmem>>, %arg2: memref<48x256xf32, #tpu.memory_space<vmem>>, %arg3: memref<48x1024xf32, #tpu.memory_space<vmem>>, %arg4: memref<40x48xi32, #tpu.memory_space<vmem>>, %arg5: memref<40x48xf32, #tpu.memory_space<vmem>>, %arg6: memref<40x1024xf32, #tpu.memory_space<vmem>>) attributes {dimension_semantics = [#tpu.dimension_semantics<parallel>], iteration_bounds = array<i64: 2>, scalar_prefetch = 0 : i64, scratch_operands = 0 : i64, tpu.core_type = #tpu.core_type<tc>, window_params = [{transform_indices = @transform_0, window_bounds = array<i64: 40, 256>}, {transform_indices = @transform_1, window_bounds = array<i64: 48, 256>}, {transform_indices = @transform_2, window_bounds = array<i64: 48, 1024>}, {transform_indices = @transform_3, window_bounds = array<i64: 40, 48>}, {pipeline_mode = #tpu.pipeline_mode<synchronous>, transform_indices = @transform_4, window_bounds = array<i64: 40, 48>}, {transform_indices = @transform_5, window_bounds = array<i64: 40, 1024>}]} {
    %c0 = arith.constant 0 : index
    %c0_0 = arith.constant 0 : index
    %0 = vector.load %arg1[%c0, %c0_0] : memref<40x256xf32, #tpu.memory_space<vmem>>, vector<40x256xf32>
    %1 = arith.truncf %0 : vector<40x256xf32> to vector<40x256xbf16>
    %c0_1 = arith.constant 0 : index
    %c0_2 = arith.constant 0 : index
    %2 = vector.load %arg2[%c0_1, %c0_2] : memref<48x256xf32, #tpu.memory_space<vmem>>, vector<48x256xf32>
    %3 = arith.truncf %2 : vector<48x256xf32> to vector<48x256xbf16>
    %cst = arith.constant dense<0.000000e+00> : vector<40x48xf32>
    %4 = tpu.matmul %1, %3, %cst {dimension_numbers = #tpu.dot_dimension_numbers<[1], [1], [0], [0], [0, 0, 1, 0], [], []>} : vector<40x256xbf16>, vector<48x256xbf16>, vector<40x48xf32> -> vector<40x48xf32>
    %cst_3 = arith.constant 5.000000e-01 : f32
    %5 = vector.broadcast %cst_3 : f32 to vector<40x48xf32>
    %6 = arith.mulf %4, %5 : vector<40x48xf32>
    %c0_4 = arith.constant 0 : index
    %c0_5 = arith.constant 0 : index
    %7 = vector.load %arg5[%c0_4, %c0_5] : memref<40x48xf32, #tpu.memory_space<vmem>>, vector<40x48xf32>
    %8 = arith.addf %6, %7 : vector<40x48xf32>
    %cst_6 = arith.constant dense<0xFF800000> : vector<40xf32>
    %9 = vector.multi_reduction <maximumf>, %8, %cst_6 [1] : vector<40x48xf32> to vector<40xf32>
    %10 = vector.shape_cast %9 : vector<40xf32> to vector<40x1xf32>
    %11 = vector.broadcast %10 : vector<40x1xf32> to vector<40x48xf32>
    %12 = arith.subf %8, %11 : vector<40x48xf32>
    %13 = math.exp %12 : vector<40x48xf32>
    %cst_7 = arith.constant dense<0.000000e+00> : vector<40xf32>
    %14 = vector.multi_reduction <add>, %13, %cst_7 [1] : vector<40x48xf32> to vector<40xf32>
    %15 = vector.shape_cast %14 : vector<40xf32> to vector<40x1xf32>
    %cst_8 = arith.constant 0.73301053 : f32
    %16 = vector.broadcast %cst_8 : f32 to vector<40x1xf32>
    %17 = arith.mulf %15, %16 : vector<40x1xf32>
    %18 = tpu.reciprocal %17 {approx = true} : vector<40x1xf32> -> vector<40x1xf32>
    %c0_9 = arith.constant 0 : index
    %c0_10 = arith.constant 0 : index
    %19 = vector.load %arg4[%c0_9, %c0_10] : memref<40x48xi32, #tpu.memory_space<vmem>>, vector<40x48xi32>
    %c1146711040_i32 = arith.constant 1146711040 : i32
    %20 = vector.broadcast %c1146711040_i32 : i32 to vector<40x48xi32>
    %21 = arith.cmpi uge, %19, %20 : vector<40x48xi32>
    %22 = vector.broadcast %18 : vector<40x1xf32> to vector<40x48xf32>
    %23 = arith.mulf %13, %22 : vector<40x48xf32>
    %cst_11 = arith.constant 0.000000e+00 : f32
    %24 = vector.broadcast %cst_11 : f32 to vector<40x48xf32>
    %25 = arith.select %21, %23, %24 : vector<40x48xi1>, vector<40x48xf32>
    %26 = arith.truncf %25 : vector<40x48xf32> to vector<40x48xbf16>
    %c0_12 = arith.constant 0 : index
    %c0_13 = arith.constant 0 : index
    %27 = vector.load %arg3[%c0_12, %c0_13] : memref<48x1024xf32, #tpu.memory_space<vmem>>, vector<48x1024xf32>
    %28 = arith.truncf %27 : vector<48x1024xf32> to vector<48x1024xbf16>
    %cst_14 = arith.constant dense<0.000000e+00> : vector<40x1024xf32>
    %29 = tpu.matmul %26, %28, %cst_14 {dimension_numbers = #tpu.dot_dimension_numbers<[1], [0], [0], [1], [0, 0, 1, 1], [], []>} : vector<40x48xbf16>, vector<48x1024xbf16>, vector<40x1024xf32> -> vector<40x1024xf32>
    %c0_15 = arith.constant 0 : index
    %c0_16 = arith.constant 0 : index
    %30 = vector.load %arg6[%c0_15, %c0_16] : memref<40x1024xf32, #tpu.memory_space<vmem>>, vector<40x1024xf32>
    tpu.vector_store %arg6[%c0_15, %c0_16], %29 {strides = array<i32>} : memref<40x1024xf32, #tpu.memory_space<vmem>>, vector<40x1024xf32>,
    return
  }
  func.func @transform_0(%arg0: i32) -> (i32, i32) {
    %c0_i32 = arith.constant 0 : i32
    %c0_i32_0 = arith.constant 0 : i32
    return %arg0, %c0_i32 : i32, i32
  }
  func.func @transform_1(%arg0: i32) -> (i32, i32) {
    %c0_i32 = arith.constant 0 : i32
    %c0_i32_0 = arith.constant 0 : i32
    return %arg0, %c0_i32 : i32, i32
  }
  func.func @transform_2(%arg0: i32) -> (i32, i32) {
    %c0_i32 = arith.constant 0 : i32
    %c0_i32_0 = arith.constant 0 : i32
    return %arg0, %c0_i32 : i32, i32
  }
  func.func @transform_3(%arg0: i32) -> (i32, i32) {
    %c0_i32 = arith.constant 0 : i32
    %c0_i32_0 = arith.constant 0 : i32
    return %arg0, %c0_i32 : i32, i32
  }
  func.func @transform_4(%arg0: i32) -> (i32, i32) {
    %c0_i32 = arith.constant 0 : i32
    %c0_i32_0 = arith.constant 0 : i32
    %c0_i32_1 = arith.constant 0 : i32
    return %c0_i32, %c0_i32_0 : i32, i32
  }
  func.func @transform_5(%arg0: i32) -> (i32, i32) {
    %c0_i32 = arith.constant 0 : i32
    %c0_i32_0 = arith.constant 0 : i32
    return %arg0, %c0_i32 : i32, i32
  }
}

</mosaic_0001>

<bundles_post_ra>
// kernel: tpu_custom_call.1
= control target key start
LH: loop header
LB: loop body
LE: loop exit
PB: predicated region body
PF: predicated region fallthrough
CT: control target
= control target key end

     0   :  { %s1813_s0 = inlined_call_operand.hbm [shape: f32[80,256], index: 0, kind: input, shape index: {}]   ;;  %s1814_s1 = inlined_call_operand.hbm [shape: f32[96,256], index: 1, kind: input, shape index: {}]   ;;  %s1815_s2 = inlined_call_operand.hbm [shape: f32[96,1024], index: 2, kind: input, shape index: {}]   ;;  %s1816_s3 = inlined_call_operand.vmem [shape: u32[80,48], index: 3, kind: input, shape index: {}]   ;;  %s1817_s4 = inlined_call_operand.vmem [shape: f32[40,48], index: 4, kind: input, shape index: {}]   ;;  %s1818_s5 = inlined_call_operand.hbm [shape: f32[80,1024], index: 5, kind: output, shape index: {}]  }
   0x1   :  { %1824 = sst [smem:[#allocation15_spill]] %s1814_s1 }
   0x2   :  { %10 = vsyncpa [#allocation3], 0 }
   0x3   :  { %12 = vsyncpa [#allocation3 + $0x1], 0 }
   0x4   :  { %13 = vsyncpa [#allocation6], 0 }
   0x5   :  { %15 = vsyncpa [#allocation6 + $0x1], 0 }
   0x6   :  { %16 = vsyncpa [#allocation4], 0 }
   0x7   :  { %18 = vsyncpa [#allocation4 + $0x1], 0  ;;  %s1374_s18 = smov 0   ;;  %s1376_s19 = smov 0  }
   0x8   :  { %s1378_s20 = smov 0   ;;  %s1380_s21 = smov 0  }
   0x9 LB: > { %1825 = sst [smem:[#allocation12_spill]] %s1327_s20  ;;  %s1395_s22 = sadd.s32 4294967295, %s1331_s21   ;;  %s1331_s21 = sphi %s1380_s21, %s1840_s21   ;;  %s1327_s20 = sphi %s1378_s20, %s1842_s20   ;;  %s1323_s19 = sphi %s1376_s19, %s1844_s19   ;;  %s1319_s18 = sphi %s1374_s18, %s1843_s18  }
   0xa   : > { %s1042_s23 = sadd.s32 4294967294, %s1331_s21   ;;  %s1399_s24 = sadd.s32 1, %s1331_s21  }
   0xb   : > { %1826 = sst [smem:[#allocation13_spill]] %s1399_s24  ;;  %s31_s25 = sadd.s32 1, %s1327_s20 }
   0xc   : > { %s28_s26 = ssub.s32 %s1331_s21, %s1399_s24  ;;  %p38_p0 = scmp.ne.s32.totalorder %s1327_s20, %s1323_s19 }
   0xd   : > { %p29_p1 = scmp.eq.s32.totalorder %s28_s26, 0  ;;  %p39_p2 = scmp.eq.s32.totalorder %s1331_s21, 0 }
   0xe   : > { %p44_p3 = scmp.ne.s32.totalorder %s1323_s19, %s1319_s18  ;;  %p45_p4 = scmp.eq.s32.totalorder %s1395_s22, 0 }
   0xf   : > { %s1411_s27 = scalar_select %p29_p1, %s1327_s20, %s31_s25  }
  0x10   : > { %p40_p5 = por %p39_p2, %p38_p0  ;;  %p1413_p6 = por %p45_p4, %p44_p3 }
  0x11   : > { %1827 = sst [smem:[#allocation14_spill]] %s1411_s27  ;;  %p167_p7 = scmp.eq.s32.totalorder %s1395_s22, 1 }
  0x12   : > { %s1828_s28 = scalar_select %p1413_p6, 1, 0 }
  0x13   : > { %p173_p8 = scmp.eq.s32.totalorder %s1042_s23, 1  ;;  %p1110_p10 = scmp.lt.s32.totalorder %s1331_s21, 2 }
  0x14   : > { %p1420_p11 = por %p167_p7, %p38_p0  ;;  %s1429_s6 = sand.u32 1, %s1327_s20  }
  0x15   : > { %p1424_p12 = por %p173_p8, %p44_p3  ;;  %p1431_p13 = pnand %p1110_p10, %p40_p5 }
  0x16   : > { %s1829_s29 = scalar_select %p1420_p11, 1, 0 }
  0x17   : > { %s1830_s30 = scalar_select %p1424_p12, 1, 0 }
  0x18   : > { %s218_s8 = sand.u32 1, %s1331_s21   ;;  %s1082_s9 = smul.u32 96, %s1429_s6 }
  0x19   : > { %s1078_s10 = smul.u32 1536, %s1331_s21  ;;  %p1051_p1 = scmp.ge.s32.totalorder %s1331_s21, 1 }
  0x1a   : > { %p269_p0 = scmp.lt.s32.totalorder %s1331_s21, 3  ;;  %s1832_s1 = sld [smem:[#allocation15_spill]] }
  0x1b   : > { %s222_s14 = scalar_lea.vmem [#allocation5], %s1082_s9  ;;  %s1451_s17 = scalar_lea.sflag [#allocation6], %s218_s8 }
  0x1c   : > { %s230_s15 = sshll.u32 %s222_s14, 4  ;;  %p1447_p2 = pnand %p1051_p1, %p269_p0  ;;  %s1445_s15 = int_to_ptr.vmem [resolvable:$true] %s230_s15 }
  0x1d   : > { %p1457_p4 = pneg %p1431_p13 }
  0x1e   : > { %s1833_s16 = scalar_select %p1447_p2, 1, 0 }
  0x20   : > { %s1443_s13 = scalar_lea.hbm %s1832_s1, %s1078_s10  ;;  %s1176_s10 = scalar_lea.hbm %s1832_s1, 3072 }
  0x21   : > { %s1171_s23 = scalar_lea.hbm %s1443_s13, 1536  ;;  %p1177_p8 = scmp.lt.u32.totalorder %s1443_s13, %s1832_s1 }
  0x22   : > { %p1172_p3 = scmp.ne.s32.totalorder %s1443_s13, %s1171_s23  ;;  %p1178_p10 = scmp.lt.u32.totalorder %s1176_s10, %s1171_s23 }
  0x23   : > { %p1180_p0 = scmp.lt.u32.totalorder %s1171_s23, %s1443_s13 }
  0x24   : > { %p1174_p5 = pnand %p1457_p4, %p1172_p3  ;;  %p1179_p1 = por %p1178_p10, %p1177_p8 }
  0x26   : > { %p1175_p7 = pneg %p1174_p5  ;;  %p1181_p9 = por %p1180_p0, %p1179_p1 }
  0x28   : > { %p1182_p12 = pnand %p1181_p9, %p1175_p7 }
  0x2a   : > { %1185 = shalt.err (!%p1182_p12)
}
  0x2b   : > { %s1186_s8 = scalar_lea.vmem %s1445_s15, 1536  ;;  %s1333_s14 = smov [#allocation5]  }
  0x2c   : > { %p1187_p3 = scmp.ne.s32.totalorder %s1445_s15, %s1186_s8  ;;  %s1191_s26 = sshll.u32 %s1333_s14, 4  ;;  %s1192_s26 = int_to_ptr.vmem [resolvable:$false] %s1191_s26 }
  0x2d   : > { %s1193_s9 = scalar_lea.vmem %s1192_s26, 3072  ;;  %p1194_p6 = scmp.lt.s32.totalorder %s1445_s15, %s1192_s26 }
  0x2e   : > { %p1189_p5 = pnand %p1187_p3, %p1457_p4  ;;  %p1195_p2 = scmp.lt.s32.totalorder %s1193_s9, %s1186_s8 }
  0x30   : > { %p1190_p11 = pneg %p1189_p5  ;;  %p1196_p8 = por %p1195_p2, %p1194_p6 }
  0x32   : > { %p1197_p10 = pnand %p1196_p8, %p1190_p11 }
  0x34   : > { %1200 = shalt.err (!%p1197_p10)
}
  0x35   : > { %s1334_s23 = smov 256   ;;  %s1335_s10 = smov 16  }
  0x36   : > { %1102 = dma.hbm_to_vmem [thread:$0]  (!%p1431_p13), %s1443_s13, 1536, %s1445_s15, %s1451_s17, %s1334_s23, %s1334_s23, %s1335_s10  }
  0x37   : > { %s1081_s11 = smul.u32 80, %s1429_s6  ;;  %s197_s20 = scalar_lea.sflag [#allocation3], %s1429_s6 }
  0x38   : > { %s1077_s12 = smul.u32 1280, %s1331_s21  ;;  %s1206_s14 = scalar_lea.hbm %s1813_s0, 2560 }
  0x39   : > { %s1083_s8 = smul.u32 384, %s1429_s6  ;;  %s200_s1 = scalar_lea.vmem [#allocation2], %s1081_s11 }
  0x3a   : > { %s1490_s9 = scalar_lea.hbm %s1813_s0, %s1077_s12  ;;  %s208_s27 = sshll.u32 %s200_s1, 4  ;;  %s1492_s27 = int_to_ptr.vmem [resolvable:$true] %s208_s27 }
  0x3b   : > { %s1201_s24 = scalar_lea.hbm %s1490_s9, 1280  ;;  %p1207_p12 = scmp.lt.u32.totalorder %s1490_s9, %s1813_s0 }
  0x3c   : > { %p1202_p6 = scmp.ne.s32.totalorder %s1490_s9, %s1201_s24  ;;  %p1208_p2 = scmp.lt.u32.totalorder %s1206_s14, %s1201_s24 }
  0x3d   : > { %p1210_p1 = scmp.lt.u32.totalorder %s1201_s24, %s1490_s9 }
  0x3e   : > { %p1204_p9 = pnand %p1202_p6, %p1457_p4  ;;  %p1209_p7 = por %p1208_p2, %p1207_p12 }
  0x40   : > { %p1205_p11 = pneg %p1204_p9  ;;  %p1211_p0 = por %p1210_p1, %p1209_p7 }
  0x42   : > { %p1212_p3 = pnand %p1211_p0, %p1205_p11 }
  0x44   : > { %1215 = shalt.err (!%p1212_p3)
}
  0x45   : > { %s1216_s1 = scalar_lea.vmem %s1492_s27, 1280  ;;  %s1336_s11 = smov [#allocation2]  }
  0x46   : > { %p1217_p5 = scmp.ne.s32.totalorder %s1492_s27, %s1216_s1  ;;  %s1221_s13 = sshll.u32 %s1336_s11, 4  ;;  %s1222_s13 = int_to_ptr.vmem [resolvable:$false] %s1221_s13 }
  0x47   : > { %s1223_s15 = scalar_lea.vmem %s1222_s13, 2560  ;;  %p1224_p6 = scmp.lt.s32.totalorder %s1492_s27, %s1222_s13 }
  0x48   : > { %p1219_p8 = pnand %p1217_p5, %p1457_p4  ;;  %p1225_p9 = scmp.lt.s32.totalorder %s1223_s15, %s1216_s1 }
  0x4a   : > { %p1220_p10 = pneg %p1219_p8  ;;  %p1226_p12 = por %p1225_p9, %p1224_p6 }
  0x4c   : > { %p1227_p2 = pnand %p1226_p12, %p1220_p10 }
  0x4e   : > { %1230 = shalt.err (!%p1227_p2)
}
  0x4f   : > { %1099 = dma.hbm_to_vmem [thread:$0]  (!%p1431_p13), %s1490_s9, 1280, %s1492_s27, %s197_s20, %s1334_s23, %s1334_s23, %s1335_s10  }
  0x50   : > { %s1079_s24 = smul.u32 6144, %s1331_s21  ;;  %s244_s14 = scalar_lea.vmem [#allocation7], %s1083_s8 }
  0x51   : > { %s252_s12 = sshll.u32 %s244_s14, 4  ;;  %s1236_s6 = scalar_lea.hbm %s1815_s2, 12288  ;;  %s1524_s12 = int_to_ptr.vmem [resolvable:$true] %s252_s12 }
  0x52   : > { %s1529_s11 = scalar_lea.hbm %s1815_s2, %s1079_s24 }
  0x53   : > { %s1231_s13 = scalar_lea.hbm %s1529_s11, 6144  ;;  %p1237_p0 = scmp.lt.u32.totalorder %s1529_s11, %s1815_s2 }
  0x54   : > { %p1232_p11 = scmp.ne.s32.totalorder %s1529_s11, %s1231_s13  ;;  %p1238_p3 = scmp.lt.u32.totalorder %s1236_s6, %s1231_s13 }
  0x55   : > { %p1240_p8 = scmp.lt.u32.totalorder %s1231_s13, %s1529_s11 }
  0x56   : > { %p1234_p7 = pnand %p1232_p11, %p1457_p4  ;;  %p1239_p5 = por %p1238_p3, %p1237_p0 }
  0x58   : > { %p1235_p1 = pneg %p1234_p7  ;;  %p1241_p10 = por %p1240_p8, %p1239_p5 }
  0x5a   : > { %p1242_p6 = pnand %p1241_p10, %p1235_p1 }
  0x5c   : > { %1245 = shalt.err (!%p1242_p6)
}
  0x5d   : > { %s1246_s8 = scalar_lea.vmem %s1524_s12, 6144  ;;  %s1337_s9 = smov [#allocation7]  }
  0x5e   : > { %p1247_p9 = scmp.ne.s32.totalorder %s1524_s12, %s1246_s8  ;;  %s1251_s15 = sshll.u32 %s1337_s9, 4  ;;  %s1252_s15 = int_to_ptr.vmem [resolvable:$false] %s1251_s15 }
  0x5f   : > { %s1253_s24 = scalar_lea.vmem %s1252_s15, 12288  ;;  %p1254_p11 = scmp.lt.s32.totalorder %s1524_s12, %s1252_s15 }
  0x60   : > { %p1249_p12 = pnand %p1247_p9, %p1457_p4  ;;  %p1255_p7 = scmp.lt.s32.totalorder %s1253_s24, %s1246_s8 }
  0x62   : > { %p1250_p2 = pneg %p1249_p12  ;;  %p1256_p0 = por %p1255_p7, %p1254_p11 }
  0x64   : > { %p1257_p3 = pnand %p1256_p0, %p1250_p2 }
  0x66   : > { %1260 = shalt.err (!%p1257_p3)
}
  0x67   : > { %s1338_s14 = smov 1024   ;;  %s1339_s26 = smov 64  }
  0x68   : > { %1105 = dma.hbm_to_vmem [thread:$0]  (!%p1431_p13), %s1529_s11, 6144, %s1524_s12, %s1451_s17, %s1338_s14, %s1338_s14, %s1339_s26  }
  0x69   : > { %p1835_p4 = scmp.ne.s32.totalorder %s1833_s16, 0 }
  0x6a   : > { %s1556_s25 = sand.u32 (!%p1835_p4), 1, %s1323_s19   ;;  %p1836_p1 = scmp.ne.s32.totalorder (!%p1835_p4), %s1828_s28, 0 }
  0x6b   : > { %273 = sbr.rel (%p1835_p4) target bundleno = 978 (0x3d2), region = 40  ;;  %s276_s13 = scalar_lea.sflag (!%p1835_p4), [#allocation3], %s1556_s25 }
  0x6c   : > { %s1084_s1 = smul.u32 (!%p1835_p4), 80, %s1556_s25 }
  0x6e   : > { %s1560_s20 = scalar_lea.vmem (!%p1835_p4), [#allocation2], %s1084_s1 }
  0x72   : > { %1306 = dma.done.wait (%p1836_p1), %s276_s13, 1280  }
  0x73   : > { %1308 = vsyncadd (%p1836_p1), %s276_s13, 4294966016  ;;  %s284_s7 = sand.u32 1, %s1395_s22   ;;  %s1085_s16 = smul.u32 96, %s1556_s25 }
  0x74   : > { %s285_s17 = scalar_lea.sflag [#allocation6], %s284_s7 }
  0x75   : > { %s288_s12 = scalar_lea.vmem [#allocation5], %s1085_s16 }
  0x76   : > { %1310 = dma.done.wait (%p1836_p1), %s285_s17, 7680  }
  0x77   : > { %1312 = vsyncadd (%p1836_p1), %s285_s17, 4294959616  ;;  %v367_v0 = vld [vmem:[%s288_s12 + $0x8] sm:$0xff]  ;;  %v369_v1 = vld [vmem:[%s288_s12 + $0x18] sm:$0xff]  ;;  %vm455_vm0 = vcmask 392192   ;;  %s1086_s14 = smul.u32 384, %s1556_s25  ;;  %s900_s10 = scalar_lea.sflag [#allocation4], %s1556_s25 }
  0x78   : > { %v366_v2 = vld [vmem:[%s288_s12] sm:$0xff]  ;;  %v379_v3 = vpack.c.bf16 %v369_v1, %v367_v0  ;;  %v368_v4 = vld [vmem:[%s288_s12 + $0x10] sm:$0xff]  ;;  %v371_v5 = vld [vmem:[%s288_s12 + $0x28] sm:$0xff]  ;;  %s342_s1 = smul.u32 5, %s1395_s22  ;;  %p1837_p8 = scmp.ne.s32.totalorder %s1829_s29, 0 }
  0x79   : > { %v373_v6 = vld [vmem:[%s288_s12 + $0x38] sm:$0xff]  ;;  %v378_v7 = vpack.c.bf16 %v368_v4, %v366_v2  ;;  %v370_v11 = vld [vmem:[%s288_s12 + $0x20] sm:$0xff]  ;;  %v372_v12 = vld [vmem:[%s288_s12 + $0x30] sm:$0xff]  ;;  %s1623_s26 = scalar_lea.vmem [#allocation7], %s1086_s14  ;;  %s1087_s17 = smul.u32 320, %s1556_s25 }
  0x7a   : > { %v381_v8 = vpack.c.bf16 %v373_v6, %v371_v5  ;;  %384 = vmatprep.subr.bf16.mxu0 %v379_v3  ;;  %v351_v9 = vld [vmem:[%s1560_s20 + $0x8] sm:$0xff]  ;;  %v353_v10 = vld [vmem:[%s1560_s20 + $0x18] sm:$0xff]  ;;  %v380_v16 = vpack.c.bf16 %v372_v12, %v370_v11  ;;  %v374_v18 = vld [vmem:[%s288_s12 + $0x40] sm:$0xff]  ;;  %p343_p13 = scmp.lt.s32.totalorder %s342_s1, 9  ;;  %s1080_s28 = smul.u32 5120, %s1395_s22 }
  0x7b   : > { %385 = vmatpush1.bf16.xpose.msra.mxu0 %v378_v7  ;;  %v361_v13 = vpack.c.bf16 %v353_v10, %v351_v9  ;;  %v375_v14 = vld [vmem:[%s288_s12 + $0x48] sm:$0xff]  ;;  %v377_v15 = vld [vmem:[%s288_s12 + $0x58] sm:$0xff]  ;;  %v376_v19 = vld [vmem:[%s288_s12 + $0x50] sm:$0xff]  ;;  %s1720_s12 = scalar_lea.vmem [#allocation8], %s1087_s17  ;;  %s1341_s8 = smov [#allocation8]  }
  0x7c   : > { %386 = vmatprep.subr.bf16.mxu0 %v381_v8  ;;  %v383_v17 = vpack.c.bf16 %v377_v15, %v375_v14  ;;  %v382_v20 = vpack.c.bf16 %v376_v19, %v374_v18  ;;  %v350_v21 = vld [vmem:[%s1560_s20] sm:$0xff]  ;;  %v352_v22 = vld [vmem:[%s1560_s20 + $0x10] sm:$0xff]  ;;  %v355_v23 = vld [vmem:[%s1560_s20 + $0x28] sm:$0xff]  ;;  %s1846_s1 = smov (!%p343_p13, %s342_s1), 9  ;;  %s914_s11 = sshll.u32 %s1720_s12, 4  ;;  %s1767_s11 = int_to_ptr.vmem [resolvable:$true] %s914_s11 }
  0x7d   : > { %416 = vmatprep.mubr.bf16.mxu0 %v361_v13  ;;  %v357_v24 = vld [vmem:[%s1560_s20 + $0x38] sm:$0xff]  ;;  %v360_v25 = vpack.c.bf16 %v352_v22, %v350_v21  ;;  %v354_v27 = vld [vmem:[%s1560_s20 + $0x20] sm:$0xff]  ;;  %v356_v28 = vld [vmem:[%s1560_s20 + $0x30] sm:$0xff]  ;;  %s1052_s13 = sshll.u32 %s1846_s1, 3  ;;  %s1765_s23 = scalar_lea.hbm %s1818_s5, %s1080_s28 }
  0x7e   : > { %v363_v26 = vpack.c.bf16 %v357_v24, %v355_v23  ;;  %v359_v29 = vld [vmem:[%s1560_s20 + $0x48] sm:$0xff]  ;;  %v362_v30 = vpack.c.bf16 %v356_v28, %v354_v27  ;;  %v358_v32 = vld [vmem:[%s1560_s20 + $0x40] sm:$0xff]  ;;  %s1657_s16 = scalar_lea.vmem %s1816_s3, %s1052_s13  ;;  %s1261_s22 = scalar_lea.vmem %s1767_s11, 5120 }
  0x7f   : > { %v365_v31 = vpack.c.bf16 %v359_v29, %v359_v29  ;;  %v364_v33 = vpack.c.bf16 %v358_v32, %v358_v32  ;;  %v445_v35 = vld [vmem:[%s1817_s4] sm:$0xff]  ;;  %v446_v39 = vld [vmem:[%s1817_s4 + $0x8] sm:$0xff]  ;;  %v447_v46 = vld [vmem:[%s1817_s4 + $0x10] sm:$0xff]  ;;  %p1262_p5 = scmp.ne.s32.totalorder %s1767_s11, %s1261_s22  ;;  %s1265_s9 = sshll.u32 %s1341_s8, 4  ;;  %s1266_s9 = int_to_ptr.vmem [resolvable:$false] %s1265_s9 }
  0x80   : > { %v448_v51 = vld [vmem:[%s1817_s4 + $0x18] sm:$0xff]  ;;  %v449_v58 = vld [vmem:[%s1817_s4 + $0x20] sm:$0xff]  ;;  %v535_v27 = vld [vmem:[%s1623_s26 + $0x8] sm:$0xff]  ;;  %s1267_s15 = scalar_lea.vmem %s1266_s9, 10240  ;;  %p1268_p9 = scmp.lt.s32.totalorder %s1767_s11, %s1266_s9 }
  0x81   : > { %v543_v28 = vld [vmem:[%s1623_s26 + $0x48] sm:$0xff]  ;;  %v542_v32 = vld [vmem:[%s1623_s26 + $0x40] sm:$0xff]  ;;  %p1263_p10 = pnand %p1262_p5, %p1837_p8  ;;  %p1269_p12 = scmp.lt.s32.totalorder %s1267_s15, %s1261_s22 }
  0x82   : > { %v539_v29 = vld [vmem:[%s1623_s26 + $0x28] sm:$0xff] }
  0x83   : > { %387 = vmatpush1.bf16.xpose.msra.mxu0 %v380_v16  ;;  %p1264_p6 = pneg %p1263_p10  ;;  %p1270_p2 = por %p1269_p12, %p1268_p9 }
  0x84   : > { %388 = vmatprep.subr.bf16.mxu0 %v383_v17 }
  0x85   : > { %p1271_p11 = pnand %p1270_p2, %p1264_p6 }
  0x8b   : > { %389 = vmatpush1.bf16.xpose.msra.mxu0 %v382_v20 }
  0x92   : > { %417 = vmatmul.mubr.bf16.vlgmr.msra.gmra.mrb[0].mxu0 %v360_v25 }
  0x93   : > { %424 = vmatprep.mubr.bf16.mxu0 %v363_v26 }
  0x9a   : > { %425 = vmatmul.mubr.bf16.gmra.mrb[4].mxu0 %v362_v30  ;;  %v583_v30 = vpack.c.bf16 %v543_v28, %v535_v27  ;;  %v561_v27 = vld [vmem:[%s1623_s26 + $0xd8] sm:$0xff] }
  0x9b   : > { %432 = vmatprep.mubr.bf16.mxu0 %v365_v31  ;;  %v534_v31 = vld [vmem:[%s1623_s26] sm:$0xff] }
  0x9c   : > { %615 = vmatprep.subr.bf16.mxu1 %v583_v30 }
  0xa2   : > { %433 = vmatmul.mubr.bf16.gmra.mrb[8].mxu0 %v364_v33  ;;  %v547_v33 = vld [vmem:[%s1623_s26 + $0x68] sm:$0xff] }
 0x165   : > { %v418_v34 = vpop.f32.mrb[0].mxu0 }
 0x166   : > { %v440_v36 = vmul.f32 0.5, %v418_v34  ;;  %v420_v37 = vpop.f32.mrb[1].mxu0  ;;  %v582_v34 = vpack.c.bf16 %v542_v32, %v534_v31 }
 0x167   : > { %v421_v38 = vpop.f32.mrb[2].mxu0  ;;  %v546_v37 = vld [vmem:[%s1623_s26 + $0x60] sm:$0xff] }
 0x168   : > { %v441_v40 = vmul.f32 0.5, %v421_v38  ;;  %v423_v41 = vpop.f32.mrb[3].mxu0  ;;  %v450_v42 = vadd.f32 %v445_v35, %v440_v36  ;;  %v587_v35 = vpack.c.bf16 %v547_v33, %v539_v29  ;;  %v538_v36 = vld [vmem:[%s1623_s26 + $0x20] sm:$0xff]  ;;  %616 = vmatpush1.bf16.msra.mxu1 %v582_v34  ;;  %v513_v33 = vld [vmem:[%s1657_s16 + $0x10] sm:$0xff] }
 0x169   : > { %v586_v38 = vpack.c.bf16 %v546_v37, %v538_v36  ;;  %v555_v41 = vld [vmem:[%s1623_s26 + $0xa8] sm:$0xff]  ;;  %v552_v34 = vld [vmem:[%s1623_s26 + $0x90] sm:$0xff]  ;;  %v514_v36 = vld [vmem:[%s1657_s16 + $0x18] sm:$0xff]  ;;  %vm518_vm3 = vcmp.ge.u32.totalorder %v513_v33, 1146711040 }
 0x16a   : > { %v456_v43 = vsel %vm455_vm0, %v450_v42, -inf  ;;  %v451_v44 = vadd.f32 %v446_v39, %v441_v40  ;;  %737 = vmatprep.subr.bf16.mxu0 %v587_v35  ;;  %v551_v39 = vld [vmem:[%s1623_s26 + $0x88] sm:$0xff]  ;;  %v560_v35 = vld [vmem:[%s1623_s26 + $0xd0] sm:$0xff]  ;;  %v569_v37 = vld [vmem:[%s1623_s26 + $0x118] sm:$0xff]  ;;  %vm519_vm4 = vcmp.ge.u32.totalorder %v514_v36, 1146711040 }
 0x16b   : > { %457 = vmax.xlane.f32.xlu0 %v456_v43  ;;  %v559_v40 = vld [vmem:[%s1623_s26 + $0xc8] sm:$0xff]  ;;  %738 = vmatpush1.bf16.msra.mxu0 %v586_v38  ;;  %v550_v43 = vld [vmem:[%s1623_s26 + $0x80] sm:$0xff]  ;;  %v577_v38 = vld [vmem:[%s1623_s26 + $0x158] sm:$0xff] }
 0x16c   : > { %v459_v49 = vsel %vm455_vm0, %v451_v44, -inf }
 0x16d   : > { %v426_v45 = vpop.f32.mrb[4].mxu0 }
 0x16e   : > { %v442_v47 = vmul.f32 0.5, %v426_v45  ;;  %v428_v48 = vpop.f32.mrb[5].mxu0  ;;  %v563_v45 = vld [vmem:[%s1623_s26 + $0xe8] sm:$0xff] }
 0x16f   : > { %460 = vmax.xlane.f32.xlu0 %v459_v49  ;;  %v429_v50 = vpop.f32.mrb[6].mxu0  ;;  %v554_v48 = vld [vmem:[%s1623_s26 + $0xa0] sm:$0xff] }
 0x170   : > { %v443_v52 = vmul.f32 0.5, %v429_v50  ;;  %v431_v53 = vpop.f32.mrb[7].mxu0  ;;  %v452_v54 = vadd.f32 %v447_v46, %v442_v47  ;;  %v595_v47 = vpack.c.bf16 %v563_v45, %v555_v41  ;;  %v562_v49 = vld [vmem:[%s1623_s26 + $0xe0] sm:$0xff]  ;;  %v601_v41 = vpack.c.bf16 %v577_v38, %v569_v37  ;;  %v541_v45 = vld [vmem:[%s1623_s26 + $0x38] sm:$0xff] }
 0x171   : > { %v594_v50 = vpack.c.bf16 %v562_v49, %v554_v48  ;;  %v571_v53 = vld [vmem:[%s1623_s26 + $0x128] sm:$0xff]  ;;  %v515_v49 = vld [vmem:[%s1657_s16 + $0x20] sm:$0xff] }
 0x172   : > { %v462_v55 = vsel %vm455_vm0, %v452_v54, -inf  ;;  %v453_v56 = vadd.f32 %v448_v51, %v443_v52  ;;  %739 = vmatprep.subr.bf16.mxu0 %v595_v47  ;;  %v567_v51 = vld [vmem:[%s1623_s26 + $0x108] sm:$0xff]  ;;  %vm520_vm5 = vcmp.ge.u32.totalorder %v515_v49, 1146711040 }
 0x173   : > { %463 = vmax.xlane.f32.xlu1 %v462_v55  ;;  %v575_v52 = vld [vmem:[%s1623_s26 + $0x148] sm:$0xff]  ;;  %740 = vmatpush1.bf16.msra.mxu0 %v594_v50  ;;  %v566_v55 = vld [vmem:[%s1623_s26 + $0x100] sm:$0xff] }
 0x174   : > { %v465_v60 = vsel %vm455_vm0, %v453_v56, -inf }
 0x175   : > { %v434_v57 = vpop.f32.mrb[8].mxu0 }
 0x176   : > { %v444_v59 = vmul.f32 0.5, %v434_v57  ;;  %v436_v61 = vpop.f32.mrb[9].mxu0  ;;  %v579_v57 = vld [vmem:[%s1623_s26 + $0x168] sm:$0xff] }
 0x177   : > { %466 = vmax.xlane.f32.xlu1 %v465_v60  ;;  %v437_v62 = vpop.f32.mrb[10].mxu0  ;;  %v570_v60 = vld [vmem:[%s1623_s26 + $0x120] sm:$0xff] }
 0x178   : > { %v438_v63 = vpop.f32.mrb[11].mxu0  ;;  %v454_v0 = vadd.f32 %v449_v58, %v444_v59  ;;  %v603_v59 = vpack.c.bf16 %v579_v57, %v571_v53  ;;  %v578_v61 = vld [vmem:[%s1623_s26 + $0x160] sm:$0xff]  ;;  %v565_v57 = vld [vmem:[%s1623_s26 + $0xf8] sm:$0xff] }
 0x179   : > { %v602_v62 = vpack.c.bf16 %v578_v61, %v570_v60  ;;  %v537_v63 = vld [vmem:[%s1623_s26 + $0x18] sm:$0xff]  ;;  %v556_v60 = vld [vmem:[%s1623_s26 + $0xb0] sm:$0xff] }
 0x17a   : > { %v468_v1 = vsel %vm455_vm0, %v454_v0, -inf  ;;  %741 = vmatprep.subr.bf16.mxu0 %v603_v59  ;;  %v564_v61 = vld [vmem:[%s1623_s26 + $0xf0] sm:$0xff] }
 0x17b   : > { %469 = vmax.xlane.f32.xlu0 %v468_v1  ;;  %742 = vmatpush1.bf16.msra.mxu0 %v602_v62  ;;  %v573_v62 = vld [vmem:[%s1623_s26 + $0x138] sm:$0xff] }
 0x1f8   : > { %v458_v2 = vpop.xlane.xlu0 %457 }
 0x1f9   : > { %v471_v3 = vsub.f32 %v450_v42, %v458_v2  ;;  %v591_v42 = vpack.c.bf16 %v559_v40, %v551_v39  ;;  %v1340_v2 = vmov 0   ;;  %v592_v39 = vpack.c.bf16 %v560_v35, %v552_v34 }
 0x1fa   : > { %647 = vmatprep.mubr.bf16.mxu1 %v1340_v2  ;;  %769 = vmatprep.mubr.bf16.mxu0 %v1340_v2 }
 0x1fb   : > { %v476_v4 = vmul.f32 1.442695, %v471_v3  ;;  %617 = vmatprep.subr.bf16.mxu1 %v591_v42 }
 0x1fc   : > { %v461_v5 = vpop.xlane.xlu0 %460 }
 0x1fd   : > { %1151 = vpow2.f32 %v476_v4  ;;  %v472_v6 = vsub.f32 %v451_v44, %v461_v5  ;;  %v558_v44 = vld [vmem:[%s1623_s26 + $0xc0] sm:$0xff] }
 0x1fe   : > { %v590_v46 = vpack.c.bf16 %v558_v44, %v550_v43  ;;  %v568_v43 = vld [vmem:[%s1623_s26 + $0x110] sm:$0xff] }
 0x1ff   : > { %v478_v7 = vmul.f32 1.442695, %v472_v6  ;;  %v576_v44 = vld [vmem:[%s1623_s26 + $0x150] sm:$0xff] }
 0x200   : > { %v464_v8 = vpop.xlane.xlu1 %463  ;;  %618 = vmatpush1.bf16.msra.mxu1 %v590_v46  ;;  %v549_v46 = vld [vmem:[%s1623_s26 + $0x78] sm:$0xff] }
 0x201   : > { %1153 = vpow2.f32 %v478_v7  ;;  %v473_v9 = vsub.f32 %v452_v54, %v464_v8  ;;  %v599_v54 = vpack.c.bf16 %v575_v52, %v567_v51  ;;  %v600_v51 = vpack.c.bf16 %v576_v44, %v568_v43 }
 0x202   : > { %v589_v53 = vpack.c.bf16 %v549_v46, %v541_v45 }
 0x203   : > { %v480_v10 = vmul.f32 1.442695, %v473_v9  ;;  %619 = vmatprep.subr.bf16.mxu1 %v599_v54  ;;  %v540_v54 = vld [vmem:[%s1623_s26 + $0x30] sm:$0xff] }
 0x204   : > { %v467_v11 = vpop.xlane.xlu1 %466 }
 0x205   : > { %1155 = vpow2.f32 %v480_v10  ;;  %v474_v12 = vsub.f32 %v453_v56, %v467_v11  ;;  %v574_v56 = vld [vmem:[%s1623_s26 + $0x140] sm:$0xff] }
 0x206   : > { %v598_v58 = vpack.c.bf16 %v574_v56, %v566_v55  ;;  %v548_v55 = vld [vmem:[%s1623_s26 + $0x70] sm:$0xff]  ;;  %v557_v56 = vld [vmem:[%s1623_s26 + $0xb8] sm:$0xff] }
 0x207   : > { %v1602_v13 = vpop.eup %1151  ;;  %v482_v14 = vmul.f32 1.442695, %v474_v12  ;;  %v511_v12 = vld [vmem:[%s1657_s16] sm:$0xff]  ;;  %v597_v59 = vpack.c.bf16 %v565_v57, %v557_v56 }
 0x208   : > { %v470_v15 = vpop.xlane.xlu0 %469  ;;  %v486_v16 = vsel %vm455_vm0, %v1602_v13, 0.0  ;;  %620 = vmatpush1.bf16.msra.mxu1 %v598_v58  ;;  %vm516_vm1 = vcmp.ge.u32.totalorder %v511_v12, 1146711040  ;;  %v588_v58 = vpack.c.bf16 %v548_v55, %v540_v54 }
 0x209   : > { %1157 = vpow2.f32 %v482_v14  ;;  %v475_v17 = vsub.f32 %v454_v0, %v470_v15  ;;  %487 = vadd.xlane.f32.xlu1 %v486_v16  ;;  %v545_v0 = vld [vmem:[%s1623_s26 + $0x58] sm:$0xff]  ;;  %v512_v14 = vld [vmem:[%s1657_s16 + $0x8] sm:$0xff] }
 0x20a   : > { %v585_v1 = vpack.c.bf16 %v545_v0, %v537_v63  ;;  %vm517_vm2 = vcmp.ge.u32.totalorder %v512_v14, 1146711040  ;;  %v581_v63 = vld [vmem:[%s1623_s26 + $0x178] sm:$0xff]  ;;  %v596_v0 = vpack.c.bf16 %v564_v61, %v556_v60 }
 0x20b   : > { %v1606_v18 = vpop.eup %1153  ;;  %v484_v19 = vmul.f32 1.442695, %v475_v17 }
 0x20c   : > { %v489_v20 = vsel %vm455_vm0, %v1606_v18, 0.0  ;;  %676 = vmatprep.subr.bf16.mxu1 %v585_v1  ;;  %v605_v1 = vpack.c.bf16 %v581_v63, %v573_v62 }
 0x20d   : > { %1159 = vpow2.f32 %v484_v19  ;;  %490 = vadd.xlane.f32.xlu0 %v489_v20  ;;  %v536_v20 = vld [vmem:[%s1623_s26 + $0x10] sm:$0xff] }
 0x20f   : > { %v1610_v21 = vpop.eup %1155 }
 0x210   : > { %v492_v22 = vsel %vm455_vm0, %v1610_v21, 0.0 }
 0x211   : > { %493 = vadd.xlane.f32.xlu1 %v492_v22  ;;  %v544_v22 = vld [vmem:[%s1623_s26 + $0x50] sm:$0xff] }
 0x212   : > { %v584_v30 = vpack.c.bf16 %v544_v22, %v536_v20 }
 0x213   : > { %v1614_v23 = vpop.eup %1157 }
 0x214   : > { %v495_v24 = vsel %vm455_vm0, %v1614_v23, 0.0 }
 0x215   : > { %496 = vadd.xlane.f32.xlu0 %v495_v24 }
 0x217   : > { %v1618_v25 = vpop.eup %1159 }
 0x218   : > { %v498_v26 = vsel %vm455_vm0, %v1618_v25, 0.0 }
 0x219   : > { %499 = vadd.xlane.f32.xlu1 %v498_v26  ;;  %v553_v26 = vld [vmem:[%s1623_s26 + $0x98] sm:$0xff] }
 0x21a   : > { %v593_v32 = vpack.c.bf16 %v561_v27, %v553_v26 }
 0x296   : > { %v488_v3 = vpop.xlane.xlu1 %487 }
 0x297   : > { %v501_v4 = vmul.f32 0.73301053, %v488_v3  ;;  %v572_v3 = vld [vmem:[%s1623_s26 + $0x130] sm:$0xff] }
 0x299   : > { %1161 = vrcp.f32 %v501_v4  ;;  %v580_v4 = vld [vmem:[%s1623_s26 + $0x170] sm:$0xff] }
 0x29a   : > { %v491_v5 = vpop.xlane.xlu0 %490 }
 0x29b   : > { %v502_v6 = vmul.f32 0.73301053, %v491_v5  ;;  %v604_v5 = vpack.c.bf16 %v580_v4, %v572_v3 }
 0x29d   : > { %1163 = vrcp.f32 %v502_v6 }
 0x29e   : > { %v494_v7 = vpop.xlane.xlu1 %493 }
 0x29f   : > { %v503_v8 = vmul.f32 0.73301053, %v494_v7 }
 0x2a1   : > { %1165 = vrcp.f32 %v503_v8 }
 0x2a2   : > { %v497_v9 = vpop.xlane.xlu0 %496 }
 0x2a3   : > { %v1162_v10 = vpop.eup %1161  ;;  %v504_v11 = vmul.f32 0.73301053, %v497_v9 }
 0x2a4   : > { %v521_v16 = vmul.f32 %v1162_v10, %v1602_v13 }
 0x2a5   : > { %1167 = vrcp.f32 %v504_v11 }
 0x2a6   : > { %v500_v15 = vpop.xlane.xlu1 %499  ;;  %v526_v28 = vsel %vm516_vm1, %v521_v16, 0.0 }
 0x2a7   : > { %v1164_v17 = vpop.eup %1163  ;;  %v505_v19 = vmul.f32 0.73301053, %v500_v15 }
 0x2a8   : > { %v522_v24 = vmul.f32 %v1164_v17, %v1606_v18 }
 0x2a9   : > { %1169 = vrcp.f32 %v505_v19 }
 0x2aa   : > { %v527_v29 = vsel %vm517_vm2, %v522_v24, 0.0 }
 0x2ab   : > { %v1166_v13 = vpop.eup %1165  ;;  %v1667_v31 = vpack.c.bf16 %v527_v29, %v526_v28 }
 0x2ac   : > { %v523_v18 = vmul.f32 %v1166_v13, %v1610_v21 }
 0x2ad   : > { %1053 = vmatmul.mubr.msk.bf16.vlgmr.msra.gmra.mrb[0].mxu1 %vm455_vm0, %v1667_v31  ;;  %1059 = vmatmul.mubr.msk.bf16.vlgmr.msra.gmra.mrb[12].mxu0 %vm455_vm0, %v1667_v31 }
 0x2ae   : > { %677 = vmatpush1.bf16.msra.mxu1 %v584_v30  ;;  %657 = vmatprep.mubr.bf16.mxu1 %v1340_v2  ;;  %v528_v47 = vsel %vm518_vm3, %v523_v18, 0.0 }
 0x2af   : > { %v1168_v40 = vpop.eup %1167  ;;  %678 = vmatprep.subr.bf16.mxu1 %v593_v32  ;;  %779 = vmatprep.mubr.bf16.mxu0 %v1340_v2 }
 0x2b0   : > { %v524_v42 = vmul.f32 %v1168_v40, %v1614_v23 }
 0x2b2   : > { %v529_v48 = vsel %vm519_vm4, %v524_v42, 0.0  ;;  %679 = vmatpush1.bf16.msra.mxu1 %v592_v39 }
 0x2b3   : > { %v1170_v21 = vpop.eup %1169  ;;  %v532_v50 = vpack.c.bf16 %v529_v48, %v528_v47  ;;  %680 = vmatprep.subr.bf16.mxu1 %v601_v41 }
 0x2b4   : > { %v525_v52 = vmul.f32 %v1170_v21, %v1618_v25 }
 0x2b5   : > { %1054 = vmatmul.mubr.msk.bf16.gmra.mrb[4].mxu1 %vm455_vm0, %v532_v50  ;;  %1060 = vmatmul.mubr.msk.bf16.gmra.mrb[16].mxu0 %vm455_vm0, %v532_v50 }
 0x2b6   : > { %667 = vmatprep.mubr.bf16.mxu1 %v1340_v2  ;;  %789 = vmatprep.mubr.bf16.mxu0 %v1340_v2  ;;  %v530_v23 = vsel %vm520_vm5, %v525_v52, 0.0 }
 0x2b7   : > { %681 = vmatpush1.bf16.msra.mxu1 %v600_v51  ;;  %v533_v25 = vpack.c.bf16 %v530_v23, %v530_v23 }
 0x2b8   : > { %798 = vmatprep.subr.bf16.mxu1 %v589_v53 }
 0x2bd   : > { %1055 = vmatmul.mubr.msk.bf16.gmra.mrb[8].mxu1 %vm455_vm0, %v533_v25  ;;  %1061 = vmatmul.mubr.msk.bf16.gmra.mrb[20].mxu0 %vm455_vm0, %v533_v25 }
 0x2be   : > { %708 = vmatprep.mubr.bf16.mxu1 %v1340_v2 }
 0x2c5   : > { %1056 = vmatmul.mubr.msk.bf16.vlgmr.msra.gmra.mrb[12].mxu1 %vm455_vm0, %v1667_v31 }
 0x2c6   : > { %799 = vmatpush1.bf16.msra.mxu1 %v588_v58  ;;  %718 = vmatprep.mubr.bf16.mxu1 %v1340_v2 }
 0x2c7   : > { %800 = vmatprep.subr.bf16.mxu1 %v597_v59 }
 0x2ca   : > { %801 = vmatpush1.bf16.msra.mxu1 %v596_v0 }
 0x2cb   : > { %802 = vmatprep.subr.bf16.mxu1 %v605_v1 }
 0x2cd   : > { %1057 = vmatmul.mubr.msk.bf16.gmra.mrb[16].mxu1 %vm455_vm0, %v532_v50 }
 0x2ce   : > { %728 = vmatprep.mubr.bf16.mxu1 %v1340_v2  ;;  %803 = vmatpush1.bf16.msra.mxu1 %v604_v5 }
 0x2d5   : > { %1058 = vmatmul.mubr.msk.bf16.gmra.mrb[20].mxu1 %vm455_vm0, %v533_v25 }
 0x2d6   : > { %830 = vmatprep.mubr.bf16.mxu1 %v1340_v2 }
 0x2dd   : > { %1062 = vmatmul.mubr.msk.bf16.vlgmr.msra.gmra.mrb[24].mxu1 %vm455_vm0, %v1667_v31 }
 0x2de   : > { %840 = vmatprep.mubr.bf16.mxu1 %v1340_v2 }
 0x2e5   : > { %1063 = vmatmul.mubr.msk.bf16.gmra.mrb[28].mxu1 %vm455_vm0, %v532_v50 }
 0x2e6   : > { %850 = vmatprep.mubr.bf16.mxu1 %v1340_v2 }
 0x2ed   : > { %1064 = vmatmul.mubr.msk.bf16.gmra.mrb[32].mxu1 %vm455_vm0, %v533_v25 }
 0x380   : > { %v649_v6 = vpop.f32.mrb[0].mxu1  ;;  %v771_v7 = vpop.f32.mrb[12].mxu0 }
 0x381   : > { %859 = vst [vmem:[%s1720_s12] sm:$0xff] %v649_v6  ;;  %863 = vst [vmem:[%s1720_s12 + $0x20] sm:$0xff] %v771_v7  ;;  %v651_v2 = vpop.f32.mrb[1].mxu1  ;;  %v773_v8 = vpop.f32.mrb[13].mxu0 }
 0x382   : > { %860 = vst [vmem:[%s1720_s12 + $0x8] sm:$0xff] %v651_v2  ;;  %864 = vst [vmem:[%s1720_s12 + $0x28] sm:$0xff] %v773_v8  ;;  %v653_v9 = vpop.f32.mrb[2].mxu1  ;;  %v775_v10 = vpop.f32.mrb[14].mxu0 }
 0x383   : > { %867 = vst [vmem:[%s1720_s12 + $0x40] sm:$0xff] %v653_v9  ;;  %871 = vst [vmem:[%s1720_s12 + $0x60] sm:$0xff] %v775_v10  ;;  %v655_v11 = vpop.f32.mrb[3].mxu1  ;;  %v777_v12 = vpop.f32.mrb[15].mxu0 }
 0x384   : > { %868 = vst [vmem:[%s1720_s12 + $0x48] sm:$0xff] %v655_v11  ;;  %872 = vst [vmem:[%s1720_s12 + $0x68] sm:$0xff] %v777_v12 }
 0x388   : > { %v659_v14 = vpop.f32.mrb[4].mxu1  ;;  %v781_v15 = vpop.f32.mrb[16].mxu0 }
 0x389   : > { %875 = vst [vmem:[%s1720_s12 + $0x80] sm:$0xff] %v659_v14  ;;  %879 = vst [vmem:[%s1720_s12 + $0xa0] sm:$0xff] %v781_v15  ;;  %v661_v16 = vpop.f32.mrb[5].mxu1  ;;  %v783_v17 = vpop.f32.mrb[17].mxu0 }
 0x38a   : > { %876 = vst [vmem:[%s1720_s12 + $0x88] sm:$0xff] %v661_v16  ;;  %880 = vst [vmem:[%s1720_s12 + $0xa8] sm:$0xff] %v783_v17  ;;  %v663_v19 = vpop.f32.mrb[6].mxu1  ;;  %v785_v20 = vpop.f32.mrb[18].mxu0 }
 0x38b   : > { %883 = vst [vmem:[%s1720_s12 + $0xc0] sm:$0xff] %v663_v19  ;;  %887 = vst [vmem:[%s1720_s12 + $0xe0] sm:$0xff] %v785_v20  ;;  %v665_v22 = vpop.f32.mrb[7].mxu1  ;;  %v787_v24 = vpop.f32.mrb[19].mxu0 }
 0x38c   : > { %884 = vst [vmem:[%s1720_s12 + $0xc8] sm:$0xff] %v665_v22  ;;  %888 = vst [vmem:[%s1720_s12 + $0xe8] sm:$0xff] %v787_v24 }
 0x390   : > { %v669_v26 = vpop.f32.mrb[8].mxu1  ;;  %v791_v27 = vpop.f32.mrb[20].mxu0 }
 0x391   : > { %891 = vst [vmem:[%s1720_s12 + $0x100] sm:$0xff] %v669_v26  ;;  %895 = vst [vmem:[%s1720_s12 + $0x120] sm:$0xff] %v791_v27  ;;  %v671_v28 = vpop.f32.mrb[9].mxu1  ;;  %v793_v29 = vpop.f32.mrb[21].mxu0 }
 0x392   : > { %892 = vst [vmem:[%s1720_s12 + $0x108] sm:$0xff] %v671_v28  ;;  %896 = vst [vmem:[%s1720_s12 + $0x128] sm:$0xff] %v793_v29  ;;  %v673_v30 = vpop.f32.mrb[10].mxu1  ;;  %v795_v13 = vpop.f32.mrb[22].mxu0 }
 0x393   : > { %v674_v31 = vpop.f32.mrb[11].mxu1  ;;  %v796_v32 = vpop.f32.mrb[23].mxu0 }
 0x398   : > { %v710_v33 = vpop.f32.mrb[12].mxu1 }
 0x399   : > { %861 = vst [vmem:[%s1720_s12 + $0x10] sm:$0xff] %v710_v33  ;;  %v712_v34 = vpop.f32.mrb[13].mxu1 }
 0x39a   : > { %862 = vst [vmem:[%s1720_s12 + $0x18] sm:$0xff] %v712_v34  ;;  %v714_v35 = vpop.f32.mrb[14].mxu1 }
 0x39b   : > { %869 = vst [vmem:[%s1720_s12 + $0x50] sm:$0xff] %v714_v35  ;;  %v716_v36 = vpop.f32.mrb[15].mxu1 }
 0x39c   : > { %870 = vst [vmem:[%s1720_s12 + $0x58] sm:$0xff] %v716_v36 }
 0x3a0   : > { %v720_v37 = vpop.f32.mrb[16].mxu1 }
 0x3a1   : > { %877 = vst [vmem:[%s1720_s12 + $0x90] sm:$0xff] %v720_v37  ;;  %v722_v38 = vpop.f32.mrb[17].mxu1 }
 0x3a2   : > { %878 = vst [vmem:[%s1720_s12 + $0x98] sm:$0xff] %v722_v38  ;;  %v724_v18 = vpop.f32.mrb[18].mxu1 }
 0x3a3   : > { %885 = vst [vmem:[%s1720_s12 + $0xd0] sm:$0xff] %v724_v18  ;;  %v726_v39 = vpop.f32.mrb[19].mxu1 }
 0x3a4   : > { %886 = vst [vmem:[%s1720_s12 + $0xd8] sm:$0xff] %v726_v39 }
 0x3a8   : > { %v730_v40 = vpop.f32.mrb[20].mxu1 }
 0x3a9   : > { %893 = vst [vmem:[%s1720_s12 + $0x110] sm:$0xff] %v730_v40  ;;  %v732_v41 = vpop.f32.mrb[21].mxu1 }
 0x3aa   : > { %894 = vst [vmem:[%s1720_s12 + $0x118] sm:$0xff] %v732_v41  ;;  %v734_v42 = vpop.f32.mrb[22].mxu1 }
 0x3ab   : > { %v735_v43 = vpop.f32.mrb[23].mxu1 }
 0x3b0   : > { %v832_v44 = vpop.f32.mrb[24].mxu1 }
 0x3b1   : > { %865 = vst [vmem:[%s1720_s12 + $0x30] sm:$0xff] %v832_v44  ;;  %v834_v45 = vpop.f32.mrb[25].mxu1 }
 0x3b2   : > { %866 = vst [vmem:[%s1720_s12 + $0x38] sm:$0xff] %v834_v45  ;;  %v836_v46 = vpop.f32.mrb[26].mxu1 }
 0x3b3   : > { %873 = vst [vmem:[%s1720_s12 + $0x70] sm:$0xff] %v836_v46  ;;  %v838_v47 = vpop.f32.mrb[27].mxu1 }
 0x3b4   : > { %874 = vst [vmem:[%s1720_s12 + $0x78] sm:$0xff] %v838_v47 }
 0x3b8   : > { %v842_v48 = vpop.f32.mrb[28].mxu1 }
 0x3b9   : > { %881 = vst [vmem:[%s1720_s12 + $0xb0] sm:$0xff] %v842_v48  ;;  %v844_v49 = vpop.f32.mrb[29].mxu1 }
 0x3ba   : > { %882 = vst [vmem:[%s1720_s12 + $0xb8] sm:$0xff] %v844_v49  ;;  %v846_v21 = vpop.f32.mrb[30].mxu1 }
 0x3bb   : > { %889 = vst [vmem:[%s1720_s12 + $0xf0] sm:$0xff] %v846_v21  ;;  %v848_v50 = vpop.f32.mrb[31].mxu1 }
 0x3bc   : > { %890 = vst [vmem:[%s1720_s12 + $0xf8] sm:$0xff] %v848_v50 }
 0x3c0   : > { %v852_v51 = vpop.f32.mrb[32].mxu1 }
 0x3c1   : > { %897 = vst [vmem:[%s1720_s12 + $0x130] sm:$0xff] %v852_v51  ;;  %v854_v52 = vpop.f32.mrb[33].mxu1 }
 0x3c2   : > { %898 = vst [vmem:[%s1720_s12 + $0x138] sm:$0xff] %v854_v52  ;;  %v856_v53 = vpop.f32.mrb[34].mxu1 }
 0x3c3   : > { %v857_v23 = vpop.f32.mrb[35].mxu1 }
 0x3c4   : > { %1274 = shalt.err (!%p1271_p11)
}
 0x3c5   : > { %s1275_s24 = scalar_lea.hbm %s1765_s23, 5120  ;;  %s1279_s1 = scalar_lea.hbm %s1818_s5, 10240 }
 0x3c6   : > { %p1276_p7 = scmp.ne.s32.totalorder %s1765_s23, %s1275_s24  ;;  %p1280_p4 = scmp.lt.u32.totalorder %s1765_s23, %s1818_s5 }
 0x3c7   : > { %p1281_p1 = scmp.lt.u32.totalorder %s1279_s1, %s1275_s24  ;;  %p1283_p5 = scmp.lt.u32.totalorder %s1275_s24, %s1765_s23 }
 0x3c8   : > { %p1277_p0 = pnand %p1276_p7, %p1837_p8 }
 0x3c9   : > { %p1282_p13 = por %p1281_p1, %p1280_p4 }
 0x3ca   : > { %p1278_p3 = pneg %p1277_p0 }
 0x3cb   : > { %p1284_p10 = por %p1283_p5, %p1282_p13 }
 0x3cd   : > { %p1285_p6 = pnand %p1284_p10, %p1278_p3 }
 0x3cf   : > { %1288 = shalt.err (!%p1285_p6)
}
 0x3d0   : > { %s1342_s7 = smov 1024   ;;  %s1343_s16 = smov 64  }
 0x3d1   : > { %1094 = dma.vmem_to_hbm [thread:$0]  (%p1837_p8), %s1767_s11, 5120, %s1765_s23, %s900_s10, %s1342_s7, %s1342_s7, %s1343_s16  }
 0x3d2 PF: > { %s929_s17 = sand.u32 1, %s1319_s18   ;;  %p1838_p9 = scmp.ne.s32.totalorder %s1830_s30, 0 }
 0x3d3   : > { %p1839_p12 = scmp.ge.s32.totalorder %s1331_s21, 2  ;;  %s930_s12 = scalar_lea.sflag [#allocation4], %s929_s17 }
 0x3d5   : > { %p1107_p2 = pnand %p1839_p12, %p1838_p9 }
 0x3d7   : > { %1314 = dma.done.wait (!%p1107_p2), %s930_s12, 5120  }
 0x3d8   : > { %1316 = vsyncadd (!%p1107_p2), %s930_s12, 4294962176  ;;  %s1840_s21 = sld [smem:[#allocation13_spill]]  ;;  %s1841_s28 = sld [smem:[#allocation12_spill]] }
 0x3d9   : > { %s1842_s20 = sld [smem:[#allocation14_spill]]  ;;  %s1843_s18 = smov %s1323_s19 }
 0x3de   : > { %p21_p11 = scmp.ge.s32.totalorder %s1840_s21, 4   ;;  %s1844_s19 = smov %s1841_s28 }
 0x3e0   :  { %23 = sbr.rel (!%p21_p11) target bundleno = 9 (0x9), region = 112 }
 0x3e7   :  { %935 = vsyncpa [#allocation3], 1 }
 0x3e8   :  { %937 = vsyncpa [#allocation3 + $0x1], 1 }
 0x3e9   :  { %938 = vsyncpa [#allocation6], 1 }
 0x3ea   :  { %940 = vsyncpa [#allocation6 + $0x1], 1 }
 0x3eb   :  { %941 = vsyncpa [#allocation4], 1 }
 0x3ec   :  { %943 = vsyncpa [#allocation4 + $0x1], 1 }

</bundles_post_ra>
